<compile_context>
chip_gen: v6e
topology: v6e:2x2x1
jax: 0.10.0
libtpu: 0.0.40
codegen_flags: <defaults>
</compile_context>

<pallas_src>
import functools

import jax
import jax.numpy as jnp
from jax.experimental import pallas as pl
from jax.experimental.pallas import tpu as pltpu


# ---------------------------------------------------------------------------
# hardware-aware budgets
# ---------------------------------------------------------------------------
def _physical_vmem_bytes():
    """Per-core VMEM capacity; conservative v7x-safe fallback (64 MiB)."""
    try:
        info = pltpu.get_tpu_info()
    except Exception:
        return 64 * 2**20
    for name in ("vmem_capacity_bytes", "vmem_size_bytes", "vmem_bytes"):
        v = getattr(info, name, None)
        if isinstance(v, int) and v > 0:
            return int(v)
    return 64 * 2**20


# ---------------------------------------------------------------------------
# shared gate math: per-channel stats -> mix -> 1D conv over channels -> sigmoid
# ---------------------------------------------------------------------------
def _gate_from_stats(s1, s2, amix_ref, wconv_ref, *, k_size, hw):
    """s1, s2: (C, 1) f32 per-channel sum and sum-of-squares over HW elements."""
    c = s1.shape[0]
    mean = s1 * (1.0 / float(hw))                       # AdaptiveAvgPool2d(1)
    # Single-pass unbiased (ddof=1) variance, f32 accumulation; clamped at 0.
    # NOTE: can cancel for |mean| >> std at very large HW (shifted sums /
    # Welford would be more robust if the gate fed precision-sensitive layers).
    denom = float(max(hw - 1, 1))                       # hw==1 -> std := 0 (torch gives NaN)
    var = (s2 - float(hw) * mean * mean) * (1.0 / denom)
    std = jnp.sqrt(jnp.maximum(var, 0.0))               # StdPool

    # 0.5*(mean+std) + w0*mean + w1*std, with (0.5+sigmoid(w_i)) precomputed.
    v = amix_ref[0] * mean + amix_ref[1] * std          # (C, 1)

    # permute/Conv2d(1,1,(1,k),pad=(k-1)//2)/permute == 1D conv over channel axis
    pad = (k_size - 1) // 2
    if pad > 0:
        z = jnp.zeros((pad, 1), dtype=v.dtype)
        vp = jnp.concatenate([z, v, z], axis=0)         # (C + k - 1, 1)
    else:
        vp = v
    y = wconv_ref[0] * vp[0:c, :]
    for j in range(1, k_size):                          # k is small & static -> unrolled
        y = y + wconv_ref[j] * vp[j:j + c, :]
    return jax.nn.sigmoid(y)                            # (C, 1)


# ---------------------------------------------------------------------------
# fused slab-resident kernel (one grid step per batch element)
# ---------------------------------------------------------------------------
def _mca_fused_kernel(amix_ref, wconv_ref, x_ref, o_ref, *, k_size, hw, chunk):
    """amix_ref: SMEM (2,), wconv_ref: SMEM (k,), x_ref/o_ref: VMEM (1, C, HW).

    The slab stays in its native dtype in VMEM; stats and gate application run
    over lane-aligned HW chunks so only O(C * chunk) f32 temporaries coexist.
    """
    c = x_ref.shape[1]
    starts = list(range(0, hw, chunk))                  # static, short (<= ~16)

    s1 = jnp.zeros((c, 1), jnp.float32)
    s2 = jnp.zeros((c, 1), jnp.float32)
    for st in starts:
        sz = min(chunk, hw - st)
        xc = x_ref[0, :, pl.ds(st, sz)].astype(jnp.float32)
        s1 = s1 + jnp.sum(xc, axis=1, keepdims=True)
        s2 = s2 + jnp.sum(xc * xc, axis=1, keepdims=True)

    gate = _gate_from_stats(s1, s2, amix_ref, wconv_ref, k_size=k_size, hw=hw)

    for st in starts:
        sz = min(chunk, hw - st)
        xc = x_ref[0, :, pl.ds(st, sz)].astype(jnp.float32)
        o_ref[0, :, pl.ds(st, sz)] = (xc * gate).astype(o_ref.dtype)


# ---------------------------------------------------------------------------
# tiled path, pass 1: per-channel sum / sumsq accumulation over HW chunks
# ---------------------------------------------------------------------------
def _mca_stats_kernel(amix_ref, wconv_ref, x_ref, gate_ref, s1_ref, s2_ref,
                      *, k_size, hw, t_hw):
    h = pl.program_id(1)
    nh = pl.num_programs(1)

    @pl.when(h == 0)
    def _init():
        s1_ref[...] = jnp.zeros_like(s1_ref)
        s2_ref[...] = jnp.zeros_like(s2_ref)

    xf = x_ref[0].astype(jnp.float32)                   # (C, T_HW)

    if hw % t_hw == 0:
        s1_ref[...] += jnp.sum(xf, axis=1, keepdims=True)
        s2_ref[...] += jnp.sum(xf * xf, axis=1, keepdims=True)
    else:
        rem = hw % t_hw                                 # static, valid lanes in last chunk

        @pl.when(h < nh - 1)                            # steady state: unmasked
        def _steady():
            s1_ref[...] += jnp.sum(xf, axis=1, keepdims=True)
            s2_ref[...] += jnp.sum(xf * xf, axis=1, keepdims=True)

        @pl.when(h == nh - 1)                           # ragged final chunk: masked
        def _ragged():
            lane = jax.lax.broadcasted_iota(jnp.int32, xf.shape, 1)
            xm = jnp.where(lane < rem, xf, 0.0)
            s1_ref[...] += jnp.sum(xm, axis=1, keepdims=True)
            s2_ref[...] += jnp.sum(xm * xm, axis=1, keepdims=True)

    @pl.when(h == nh - 1)
    def _finalize():
        gate_ref[0] = _gate_from_stats(s1_ref[...], s2_ref[...],
                                       amix_ref, wconv_ref,
                                       k_size=k_size, hw=hw)


# ---------------------------------------------------------------------------
# tiled path, pass 2: apply the gate (fully parallel over batch x HW chunks)
# ---------------------------------------------------------------------------
def _mca_apply_kernel(gate_ref, x_ref, o_ref):
    g = gate_ref[0]                                     # (C, 1) f32
    o_ref[0] = (x_ref[0].astype(jnp.float32) * g).astype(o_ref.dtype)


# ---------------------------------------------------------------------------
# tiling helpers
# ---------------------------------------------------------------------------
def _pick_fused_chunk(hw, max_chunks=16, min_chunk=2048):
    """Lane-aligned in-kernel HW chunk for the fused path: bounds the f32
    temporaries while keeping the (statically unrolled) chunk loop short."""
    if hw <= min_chunk:
        return hw
    chunk = max(min_chunk, -(-hw // max_chunks))        # ceil(hw / max_chunks)
    chunk = -(-chunk // 128) * 128                      # round up to lane multiple
    return min(chunk, hw)


def _pick_hw_chunk(c, hw, itemsize, budget, target=2048):
    """Pick a lane-chunk T_HW (multiple of 128 or == HW) within the VMEM budget,
    preferring >= target/2 lanes and an even division of HW."""
    # dominant per-lane bytes of both tiled passes (double-buffered I/O + f32 temps)
    per_lane = max(2 * c * itemsize + 8 * c, 4 * c * itemsize + 4 * c)
    max_t = max(128, (budget // per_lane) // 128 * 128)
    t = int(min(target, max_t))
    if hw <= t:
        return hw                                       # full dim is always a legal block
    lo = max(128, t // 2)                               # don't drop below half target
    for cand in range(t, lo - 1, -128):                 # prefer an even division
        if hw % cand == 0:
            return cand
    return t                                            # ragged last block (masked once)


# ---------------------------------------------------------------------------
# wrapper
# ---------------------------------------------------------------------------
def mca_gate(x, mix_weight, conv_weight, *, force_tiled=False, hw_chunk=None):
    """Pallas MCAGate forward.  x: (B, C, H, W) NCHW, any float dtype."""
    B, C, H, W = x.shape
    HW = H * W
    conv_w = conv_weight.reshape(-1).astype(jnp.float32)
    k_size = int(conv_w.shape[0])
    assert k_size % 2 == 1, "only odd k_size gives 'same' conv length (as in MCA)"

    itemsize = int(jnp.dtype(x.dtype).itemsize)
    # fold 0.5*(mean+std) + w0*mean + w1*std -> (0.5+w0)*mean + (0.5+w1)*std
    amix = jax.nn.sigmoid(mix_weight.astype(jnp.float32)) + 0.5
    x2 = x.reshape(B, C, HW)                            # free reshape, native dtype

    # generation-aware budgets (v5e/v6e: 128 MiB VMEM, v7x: 64 MiB per core)
    phys_vmem = _physical_vmem_bytes()
    fused_budget = int(phys_vmem * 0.65)                # ~83 MiB / ~41 MiB
    vmem_cap = int(phys_vmem * 0.85)                    # never above physical VMEM
    chunk_budget = int(min(48 * 2**20, phys_vmem * 0.40))

    smem = pl.BlockSpec(memory_space=pltpu.MemorySpace.SMEM)

    # fused path VMEM need: double-buffered native-dtype in/out slabs + chunk-sized
    # f32 temporaries (the full slab is never up-cast).
    fchunk = _pick_fused_chunk(HW)
    fused_need = 4 * C * HW * itemsize + 3 * C * fchunk * 4
    use_fused = (not force_tiled) and (fused_need + (2 << 20)) <= fused_budget

    if use_fused:
        kernel = functools.partial(_mca_fused_kernel, k_size=k_size, hw=HW,
                                   chunk=fchunk)
        out = pl.pallas_call(
            kernel,
            out_shape=jax.ShapeDtypeStruct((B, C, HW), x.dtype),
            grid_spec=pltpu.PrefetchScalarGridSpec(
                num_scalar_prefetch=0,
                grid=(B,),
                in_specs=[smem, smem,
                          pl.BlockSpec((1, C, HW), lambda b: (b, 0, 0))],
                out_specs=pl.BlockSpec((1, C, HW), lambda b: (b, 0, 0)),
            ),
            compiler_params=pltpu.CompilerParams(
                dimension_semantics=("parallel",),
                vmem_limit_bytes=int(min(fused_need + (8 << 20), vmem_cap))),
            cost_estimate=pl.CostEstimate(
                flops=6 * B * C * HW,
                transcendentals=2 * B * C,
                bytes_accessed=2 * B * C * HW * itemsize),
        )(amix, conv_w, x2)
        return out.reshape(B, C, H, W)

    # ---- tiled two-pass path (slabs too large for VMEM) ----
    if hw_chunk is not None:
        T = int(hw_chunk)
        if T <= 0 or (T != HW and T % 128 != 0):
            raise ValueError("hw_chunk must be a positive multiple of 128 or == H*W")
        T = min(T, HW)
    else:
        T = _pick_hw_chunk(C, HW, itemsize, budget=chunk_budget)
    n_hw = pl.cdiv(HW, T)

    stats_need = 2 * C * T * itemsize + 2 * C * T * 4 + 8 * C
    stats_kernel = functools.partial(_mca_stats_kernel, k_size=k_size, hw=HW, t_hw=T)
    gate = pl.pallas_call(
        stats_kernel,
        out_shape=jax.ShapeDtypeStruct((B, C, 1), jnp.float32),
        grid_spec=pltpu.PrefetchScalarGridSpec(
            num_scalar_prefetch=0,
            grid=(B, n_hw),
            in_specs=[smem, smem,
                      pl.BlockSpec((1, C, T), lambda b, h: (b, 0, h))],
            out_specs=pl.BlockSpec((1, C, 1), lambda b, h: (b, 0, 0)),
            scratch_shapes=[pltpu.VMEM((C, 1), jnp.float32),
                            pltpu.VMEM((C, 1), jnp.float32)],
        ),
        compiler_params=pltpu.CompilerParams(
            dimension_semantics=("parallel", "arbitrary"),
            vmem_limit_bytes=int(min(stats_need + (8 << 20), vmem_cap))),
        cost_estimate=pl.CostEstimate(
            flops=4 * B * C * HW,
            transcendentals=2 * B * C,
            bytes_accessed=B * C * HW * itemsize + 4 * B * C),
    )(amix, conv_w, x2)

    apply_need = 4 * C * T * itemsize + C * T * 4
    out = pl.pallas_call(
        _mca_apply_kernel,
        out_shape=jax.ShapeDtypeStruct((B, C, HW), x.dtype),
        grid_spec=pltpu.PrefetchScalarGridSpec(
            num_scalar_prefetch=0,
            grid=(B, n_hw),
            in_specs=[pl.BlockSpec((1, C, 1), lambda b, h: (b, 0, 0)),
                      pl.BlockSpec((1, C, T), lambda b, h: (b, 0, h))],
            out_specs=pl.BlockSpec((1, C, T), lambda b, h: (b, 0, h)),
        ),
        compiler_params=pltpu.CompilerParams(
            dimension_semantics=("parallel", "parallel"),
            vmem_limit_bytes=int(min(apply_need + (8 << 20), vmem_cap))),
        cost_estimate=pl.CostEstimate(
            flops=B * C * HW,
            transcendentals=0,
            bytes_accessed=2 * B * C * HW * itemsize + 4 * B * C),
    )(gate, x2)
    return out.reshape(B, C, H, W)


# ---------------------------------------------------------------------------
# pure-JAX reference mirroring the PyTorch forward
# ---------------------------------------------------------------------------
def mca_gate_ref(x, mix_weight, conv_weight):
    B, C, H, W = x.shape
    k = int(conv_weight.reshape(-1).shape[0])
    cw = conv_weight.reshape(-1).astype(jnp.float32)
    x2 = x.reshape(B, C, -1).astype(jnp.float32)
    mean = x2.mean(axis=2)
    std = x2.std(axis=2, ddof=1)
    w = jax.nn.sigmoid(mix_weight.astype(jnp.float32))
    v = 0.5 * (mean + std) + w[0] * mean + w[1] * std   # (B, C)
    pad = (k - 1) // 2
    vp = jnp.pad(v, ((0, 0), (pad, pad)))
    y = sum(cw[j] * vp[:, j:j + C] for j in range(k))
    gate = jax.nn.sigmoid(y)[:, :, None, None]
    return (x * gate).astype(x.dtype)


if __name__ == "__main__":
    key = jax.random.PRNGKey(0)
    kx, kw, kc = jax.random.split(key, 3)

    B, C, H, W = 2, 4, 16, 16
    k_size = 3
    x = jax.random.normal(kx, (B, C, H, W), dtype=jnp.float32)
    # nn.Parameter(torch.rand(2)) -> uniform [0, 1)
    mix_weight = jax.random.uniform(kw, (2,), dtype=jnp.float32)
    # Conv2d(1, 1, (1, k), bias=False) weight: keep the k taps
    conv_weight = jax.random.normal(kc, (k_size,), dtype=jnp.float32) * 0.5

    ref = mca_gate_ref(x, mix_weight, conv_weight)

    # 1) fused slab-resident path (f32)
    out_fused = jax.block_until_ready(mca_gate(x, mix_weight, conv_weight))
    assert out_fused.shape == x.shape and out_fused.dtype == x.dtype
    assert jnp.allclose(out_fused, ref, atol=1e-5, rtol=1e-5), "fused mismatch"

    # 2) tiled two-pass path, forced HW chunking (exercises scratch accumulation)
    out_tiled = jax.block_until_ready(
        mca_gate(x, mix_weight, conv_weight, force_tiled=True, hw_chunk=128))
    assert jnp.allclose(out_tiled, ref, atol=1e-5, rtol=1e-5), "tiled mismatch"

    # 3) native bf16 I/O (no f32 up-cast copy in HBM; cast happens in-kernel)
    xb = x.astype(jnp.bfloat16)
    out_bf16 = jax.block_until_ready(mca_gate(xb, mix_weight, conv_weight))
    assert out_bf16.dtype == jnp.bfloat16
    ref_bf16 = mca_gate_ref(xb, mix_weight, conv_weight)
    assert jnp.allclose(out_bf16.astype(jnp.float32),
                        ref_bf16.astype(jnp.float32),
                        atol=3e-2, rtol=3e-2), "bf16 mismatch"

    # 4) ragged HW (9*15 = 135) on the tiled path: exercises the
    #    masked-final-chunk stats accumulation and boundary output blocks
    xr = jax.random.normal(jax.random.PRNGKey(1), (2, 4, 9, 15), dtype=jnp.float32)
    ref_r = mca_gate_ref(xr, mix_weight, conv_weight)
    out_r = jax.block_until_ready(
        mca_gate(xr, mix_weight, conv_weight, force_tiled=True, hw_chunk=128))
    assert jnp.allclose(out_r, ref_r, atol=1e-5, rtol=1e-5), "ragged tiled mismatch"

    print("KERNEL_OK")
</pallas_src>

<mosaic_0001>
module attributes {stable_mosaic.version = 11 : i64} {
  func.func @_mca_fused_kernel(%arg0: i32, %arg1: memref<2xf32, #tpu.memory_space<smem>>, %arg2: memref<3xf32, #tpu.memory_space<smem>>, %arg3: memref<1x4x256xf32, #tpu.memory_space<vmem>>, %arg4: memref<1x4x256xf32, #tpu.memory_space<vmem>>) attributes {dimension_semantics = [#tpu.dimension_semantics<parallel>], iteration_bounds = array<i64: 2>, scalar_prefetch = 0 : i64, scratch_operands = 0 : i64, tpu.core_type = #tpu.core_type<tc>, window_params = [{transform_indices = @transform_0, window_bounds = array<i64: 2>}, {transform_indices = @transform_1, window_bounds = array<i64: 3>}, {transform_indices = @transform_2, window_bounds = array<i64: 1, 4, 256>}, {transform_indices = @transform_3, window_bounds = array<i64: 1, 4, 256>}]} {
    %cst = arith.constant 0.000000e+00 : f32
    %0 = vector.broadcast %cst : f32 to vector<4x1xf32>
    %cst_0 = arith.constant 0.000000e+00 : f32
    %1 = vector.broadcast %cst_0 : f32 to vector<4x1xf32>
    %c0 = arith.constant 0 : index
    %c0_1 = arith.constant 0 : index
    %c0_2 = arith.constant 0 : index
    %2 = vector.load %arg3[%c0, %c0_1, %c0_2] : memref<1x4x256xf32, #tpu.memory_space<vmem>>, vector<1x4x256xf32>
    %3 = vector.shape_cast %2 : vector<1x4x256xf32> to vector<4x256xf32>
    %cst_3 = arith.constant dense<0.000000e+00> : vector<4xf32>
    %4 = vector.multi_reduction <add>, %3, %cst_3 [1] : vector<4x256xf32> to vector<4xf32>
    %5 = vector.shape_cast %4 : vector<4xf32> to vector<4x1xf32>
    %6 = arith.addf %0, %5 : vector<4x1xf32>
    %7 = arith.mulf %3, %3 : vector<4x256xf32>
    %cst_4 = arith.constant dense<0.000000e+00> : vector<4xf32>
    %8 = vector.multi_reduction <add>, %7, %cst_4 [1] : vector<4x256xf32> to vector<4xf32>
    %9 = vector.shape_cast %8 : vector<4xf32> to vector<4x1xf32>
    %10 = arith.addf %1, %9 : vector<4x1xf32>
    %cst_5 = arith.constant 3.906250e-03 : f32
    %11 = vector.broadcast %cst_5 : f32 to vector<4x1xf32>
    %12 = arith.mulf %6, %11 : vector<4x1xf32>
    %cst_6 = arith.constant 2.560000e+02 : f32
    %13 = vector.broadcast %cst_6 : f32 to vector<4x1xf32>
    %14 = arith.mulf %13, %12 : vector<4x1xf32>
    %15 = arith.mulf %14, %12 : vector<4x1xf32>
    %16 = arith.subf %10, %15 : vector<4x1xf32>
    %cst_7 = arith.constant 0.00392156886 : f32
    %17 = vector.broadcast %cst_7 : f32 to vector<4x1xf32>
    %18 = arith.mulf %16, %17 : vector<4x1xf32>
    %cst_8 = arith.constant 0.000000e+00 : f32
    %19 = vector.broadcast %cst_8 : f32 to vector<4x1xf32>
    %20 = arith.maximumf %18, %19 : vector<4x1xf32>
    %21 = math.sqrt %20 : vector<4x1xf32>
    %c0_9 = arith.constant 0 : index
    %22 = memref.load %arg1[%c0_9] : memref<2xf32, #tpu.memory_space<smem>>
    %23 = vector.broadcast %22 : f32 to vector<4x1xf32>
    %24 = arith.mulf %23, %12 : vector<4x1xf32>
    %c1 = arith.constant 1 : index
    %25 = memref.load %arg1[%c1] : memref<2xf32, #tpu.memory_space<smem>>
    %26 = vector.broadcast %25 : f32 to vector<4x1xf32>
    %27 = arith.mulf %26, %21 : vector<4x1xf32>
    %28 = arith.addf %24, %27 : vector<4x1xf32>
    %cst_10 = arith.constant 0.000000e+00 : f32
    %29 = vector.broadcast %cst_10 : f32 to vector<1x1xf32>
    %30 = tpu.concatenate %29, %28, %29 in 0 : vector<1x1xf32>, vector<4x1xf32>, vector<1x1xf32> -> vector<6x1xf32>
    %c0_11 = arith.constant 0 : index
    %31 = memref.load %arg2[%c0_11] : memref<3xf32, #tpu.memory_space<smem>>
    %32 = vector.extract_strided_slice %30 {offsets = [0, 0], sizes = [4, 1], strides = [1, 1]} : vector<6x1xf32> to vector<4x1xf32>
    %33 = vector.broadcast %31 : f32 to vector<4x1xf32>
    %34 = arith.mulf %33, %32 : vector<4x1xf32>
    %c1_12 = arith.constant 1 : index
    %35 = memref.load %arg2[%c1_12] : memref<3xf32, #tpu.memory_space<smem>>
    %36 = vector.extract_strided_slice %30 {offsets = [1, 0], sizes = [4, 1], strides = [1, 1]} : vector<6x1xf32> to vector<4x1xf32>
    %37 = vector.broadcast %35 : f32 to vector<4x1xf32>
    %38 = arith.mulf %37, %36 : vector<4x1xf32>
    %39 = arith.addf %34, %38 : vector<4x1xf32>
    %c2 = arith.constant 2 : index
    %40 = memref.load %arg2[%c2] : memref<3xf32, #tpu.memory_space<smem>>
    %41 = vector.extract_strided_slice %30 {offsets = [2, 0], sizes = [4, 1], strides = [1, 1]} : vector<6x1xf32> to vector<4x1xf32>
    %42 = vector.broadcast %40 : f32 to vector<4x1xf32>
    %43 = arith.mulf %42, %41 : vector<4x1xf32>
    %44 = arith.addf %39, %43 : vector<4x1xf32>
    %45 = arith.negf %44 : vector<4x1xf32>
    %46 = math.exp %45 : vector<4x1xf32>
    %cst_13 = arith.constant 1.000000e+00 : f32
    %47 = vector.broadcast %cst_13 : f32 to vector<4x1xf32>
    %48 = arith.addf %47, %46 : vector<4x1xf32>
    %49 = arith.divf %47, %48 : vector<4x1xf32>
    %c0_14 = arith.constant 0 : index
    %c0_15 = arith.constant 0 : index
    %c0_16 = arith.constant 0 : index
    %50 = vector.load %arg3[%c0_14, %c0_15, %c0_16] : memref<1x4x256xf32, #tpu.memory_space<vmem>>, vector<1x4x256xf32>
    %51 = vector.shape_cast %50 : vector<1x4x256xf32> to vector<4x256xf32>
    %52 = vector.broadcast %49 : vector<4x1xf32> to vector<4x256xf32>
    %53 = arith.mulf %51, %52 : vector<4x256xf32>
    %c0_17 = arith.constant 0 : index
    %c0_18 = arith.constant 0 : index
    %c0_19 = arith.constant 0 : index
    %54 = vector.load %arg4[%c0_17, %c0_18, %c0_19] : memref<1x4x256xf32, #tpu.memory_space<vmem>>, vector<1x4x256xf32>
    %55 = vector.shape_cast %54 : vector<1x4x256xf32> to vector<4x256xf32>
    %56 = vector.shape_cast %53 : vector<4x256xf32> to vector<1x4x256xf32>
    tpu.vector_store %arg4[%c0_17, %c0_18, %c0_19], %56 {strides = array<i32>} : memref<1x4x256xf32, #tpu.memory_space<vmem>>, vector<1x4x256xf32>,
    return
  }
  func.func @transform_0(%arg0: i32) -> i32 {
    %c0_i32 = arith.constant 0 : i32
    %c0_i32_0 = arith.constant 0 : i32
    return %c0_i32 : i32
  }
  func.func @transform_1(%arg0: i32) -> i32 {
    %c0_i32 = arith.constant 0 : i32
    %c0_i32_0 = arith.constant 0 : i32
    return %c0_i32 : i32
  }
  func.func @transform_2(%arg0: i32) -> (i32, i32, i32) {
    %c0_i32 = arith.constant 0 : i32
    %c0_i32_0 = arith.constant 0 : i32
    %c0_i32_1 = arith.constant 0 : i32
    return %arg0, %c0_i32, %c0_i32_0 : i32, i32, i32
  }
  func.func @transform_3(%arg0: i32) -> (i32, i32, i32) {
    %c0_i32 = arith.constant 0 : i32
    %c0_i32_0 = arith.constant 0 : i32
    %c0_i32_1 = arith.constant 0 : i32
    return %arg0, %c0_i32, %c0_i32_0 : i32, i32, i32
  }
}

</mosaic_0001>

<bundles_post_ra>
// kernel: tpu_custom_call.1
= control target key start
LH: loop header
LB: loop body
LE: loop exit
PB: predicated region body
PF: predicated region fallthrough
CT: control target
= control target key end

     0   :  { %8 = vsyncpa [#allocation5], 0  ;;  %s843_s0 = inlined_call_operand.hbm [shape: f32[2], index: 0, kind: input, shape index: {}]   ;;  %s844_s1 = inlined_call_operand.vmem [shape: f32[3], index: 1, kind: input, shape index: {}]   ;;  %s845_s2 = inlined_call_operand.hbm [shape: f32[2,4,256], index: 2, kind: input, shape index: {}]   ;;  %s846_s3 = inlined_call_operand.hbm [shape: f32[2,4,256], index: 3, kind: output, shape index: {}]  }
   0x1   :  { %9 = vsyncpa [#allocation6], 0 }
   0x2   :  { %10 = vsyncpa [#allocation3], 0 }
   0x3   :  { %12 = vsyncpa [#allocation3 + $0x1], 0 }
   0x4   :  { %13 = vsyncpa [#allocation4], 0 }
   0x5   :  { %15 = vsyncpa [#allocation4 + $0x1], 0  ;;  %s662_s12 = smov 0   ;;  %s664_s13 = smov 0  }
   0x6   :  { %s666_s14 = smov 0   ;;  %s668_s15 = smov 0  }
   0x7 LB: > { %s683_s16 = sadd.s32 4294967295, %s634_s15   ;;  %s406_s17 = sadd.s32 4294967294, %s634_s15   ;;  %s634_s15 = sphi %s668_s15, %s870_s15   ;;  %s630_s14 = sphi %s666_s14, %s869_s14   ;;  %s626_s13 = sphi %s664_s13, %s868_s13   ;;  %s622_s12 = sphi %s662_s12, %s867_s12  }
   0x8   : > { %p83_p0 = scmp.ne.s32.totalorder %s626_s13, %s622_s12  ;;  %p847_p1 = scmp.eq.s32.totalorder %s683_s16, 0 }
   0x9   : > { %p107_p2 = scmp.eq.s32.totalorder %s683_s16, 1  ;;  %p113_p3 = scmp.eq.s32.totalorder %s406_s17, 1 }
   0xa   : > { %p692_p4 = por %p847_p1, %p83_p0  ;;  %p407_p5 = scmp.ge.s32.totalorder %s634_s15, 1 }
   0xb   : > { %p697_p6 = por %p113_p3, %p83_p0  ;;  %p120_p7 = scmp.lt.s32.totalorder %s634_s15, 3 }
   0xc   : > { %s851_s18 = scalar_select %p692_p4, 1, 0 }
   0xd   : > { %s852_s19 = scalar_select %p697_p6, 1, 0 }
   0xe   : > { %p702_p8 = pnand %p407_p5, %p120_p7  ;;  %s142_s23 = sshll.u32 %s844_s1, 4  ;;  %s143_s23 = int_to_ptr.vmem [resolvable:$true] %s142_s23 }
   0xf   : > { %s713_s24 = sadd.s32 1, %s634_s15   ;;  %s70_s27 = sadd.s32 1, %s630_s14 }
  0x10   : > { %s853_s20 = scalar_select %p702_p8, 1, 0 }
  0x11   : > { %p442_p10 = pneg %p702_p8  ;;  %s67_s26 = ssub.s32 %s634_s15, %s713_s24 }
  0x12   : > { %p724_p12 = scmp.eq.s32.totalorder %s67_s26, 0  ;;  %s636_s29 = smov [#allocation2]  }
  0x13   : > { %p717_p11 = pnand %p442_p10, %p847_p1  ;;  %s519_s5 = scalar_lea.vmem %s143_s23, 16 }
  0x14   : > { %p520_p13 = scmp.ne.s32.totalorder %s143_s23, %s519_s5  ;;  %p527_p7 = scmp.lt.s32.totalorder %s143_s23, %s143_s23 }
  0x15   : > { %445 = dma.hbm_to_smem (!%p717_p11), %s843_s0, 16, %s636_s29, [#allocation5]  }
  0x16   : > { %p521_p0 = pneg %p717_p11  ;;  %p528_p10 = scmp.lt.s32.totalorder %s519_s5, %s519_s5 }
  0x18   : > { %p522_p3 = pnand %p521_p0, %p520_p13  ;;  %p529_p9 = por %p528_p10, %p527_p7 }
  0x1a   : > { %p523_p5 = pneg %p522_p3 }
  0x1c   : > { %p530_p1 = pnand %p529_p9, %p523_p5 }
  0x1e   : > { %533 = shalt.err (!%p530_p1)
}
  0x1f   : > { %s637_s6 = smov [#allocation7]   ;;  %p77_p13 = scmp.ne.s32.totalorder %s630_s14, %s626_s13 }
  0x20   : > { %448 = dma.vmem_to_smem (!%p717_p11), %s143_s23, 16, %s637_s6, [#allocation6]  }
  0x21   : > { %s740_s7 = scalar_select %p724_p12, %s630_s14, %s70_s27  }
  0x22   : > { %p78_p0 = scmp.eq.s32.totalorder %s634_s15, 0  ;;  %p459_p9 = scmp.lt.s32.totalorder %s634_s15, 2 }
  0x23   : > { %s153_s8 = sand.u32 1, %s630_s14   ;;  %p749_p3 = por %p107_p2, %p77_p13 }
  0x24   : > { %p79_p1 = por %p78_p0, %p77_p13  ;;  %s411_s10 = sshll.u32 %s153_s8, 3 }
  0x25   : > { %s856_s9 = scalar_select %p749_p3, 1, 0 }
  0x26   : > { %s428_s11 = sshll.u32 %s634_s15, 7  ;;  %s157_s23 = scalar_lea.vmem [#allocation8], %s411_s10 }
  0x27   : > { %s757_s22 = scalar_lea.hbm %s845_s2, %s428_s11  ;;  %s165_s25 = sshll.u32 %s157_s23, 4  ;;  %s166_s25 = int_to_ptr.vmem [resolvable:$true] %s165_s25 }
  0x28   : > { %p759_p11 = pnand %p459_p9, %p79_p1  ;;  %s154_s27 = scalar_lea.sflag [#allocation3], %s153_s8 }
  0x29   : > { %s534_s28 = scalar_lea.hbm %s757_s22, 128  ;;  %s539_s4 = scalar_lea.hbm %s845_s2, 256 }
  0x2a   : > { %p535_p2 = scmp.ne.s32.totalorder %s757_s22, %s534_s28  ;;  %p536_p12 = pneg %p759_p11 }
  0x2b   : > { %p540_p10 = scmp.lt.s32.totalorder %s757_s22, %s845_s2  ;;  %p541_p13 = scmp.lt.s32.totalorder %s539_s4, %s534_s28 }
  0x2c   : > { %p537_p5 = pnand %p536_p12, %p535_p2 }
  0x2d   : > { %p542_p0 = por %p541_p13, %p540_p10 }
  0x2e   : > { %p538_p7 = pneg %p537_p5 }
  0x30   : > { %p543_p9 = pnand %p542_p0, %p538_p7 }
  0x32   : > { %546 = shalt.err (!%p543_p9)
}
  0x33   : > { %s547_s10 = scalar_lea.vmem %s166_s25, 128  ;;  %s638_s8 = smov [#allocation8]  }
  0x34   : > { %p548_p1 = scmp.ne.s32.totalorder %s166_s25, %s547_s10  ;;  %s552_s11 = sshll.u32 %s638_s8, 4  ;;  %s553_s11 = int_to_ptr.vmem [resolvable:$false] %s552_s11 }
  0x35   : > { %s554_s17 = scalar_lea.vmem %s553_s11, 256  ;;  %p555_p2 = scmp.lt.s32.totalorder %s166_s25, %s553_s11 }
  0x36   : > { %p550_p6 = pnand %p548_p1, %p536_p12  ;;  %p556_p5 = scmp.lt.s32.totalorder %s554_s17, %s547_s10 }
  0x38   : > { %p551_p3 = pneg %p550_p6  ;;  %p557_p4 = por %p556_p5, %p555_p2 }
  0x3a   : > { %p558_p8 = pnand %p557_p4, %p551_p3 }
  0x3c   : > { %561 = shalt.err (!%p558_p8)
}
  0x3d   : > { %452 = dma.hbm_to_vmem [thread:$0]  (!%p759_p11), %s757_s22, 128, %s166_s25, %s154_s27  }
  0x3e   : > { %p858_p7 = scmp.ne.s32.totalorder %s853_s20, 0 }
  0x3f   : > { %p859_p10 = scmp.eq.s32.totalorder (!%p858_p7), %s683_s16, 0 }
  0x40   : > { %174 = sbr.rel (%p858_p7) target bundleno = 443 (0x1bb), region = 32 }
  0x45   : > { %605 = dma.done.wait (%p859_p10), [#allocation5], 16   ;;  %p860_p6 = pmov %p859_p10 }
  0x47   : > { %607 = vsyncadd (%p860_p6), [#allocation5], 4294967280  ;;  %p861_p12 = pmov %p860_p6 }
  0x48   : > { %p862_p13 = pmov %p860_p6 }
  0x49   : > { %609 = dma.done.wait (%p861_p12), [#allocation6], 16  }
  0x4a   : > { %611 = vsyncadd (%p862_p13), [#allocation6], 4294967280  ;;  %s788_s21 = sand.u32 1, %s626_s13   ;;  %p863_p4 = scmp.ne.s32.totalorder %s851_s18, 0 }
  0x4b   : > { %s417_s20 = sshll.u32 %s788_s21, 3  ;;  %s185_s22 = scalar_lea.sflag [#allocation3], %s788_s21 }
  0x4c   : > { %s188_s23 = scalar_lea.vmem [#allocation8], %s417_s20 }
  0x4d   : > { %613 = dma.done.wait (%p863_p4), %s185_s22, 128  }
  0x4e   : > { %615 = vsyncadd (%p863_p4), %s185_s22, 4294967168 }
  0x4f   : > { %193 = sfence }
  0x50   : > { %v798_v0 = vld [vmem:[%s188_s23] sm:$0xff]  ;;  %vm216_vm0 = vcmask 1043456   ;;  %v639_v10 = vmov 0   ;;  %s246_s18 = sld [smem:[#allocation2]]  ;;  %vm256_vm3 = vcmask 1040384   ;;  %vm258_vm4 = vcmask 1044480  }
  0x51   : > { %v214_v1 = vcombine.high %v798_v0, %v798_v0  ;;  %v217_v2 = vsel %vm216_vm0, %v798_v0, 0.0  ;;  %v223_v3 = vmul.f32 %v798_v0, %v798_v0  ;;  %499 = vset.pattern.permute.xlu1 %v639_v10  ;;  %500 = vset.pattern.permute.xlu0 %v639_v10  ;;  %s419_s25 = sld [smem:[#allocation2 + $0x1]]  ;;  %v640_v46 = vmov 839922192   ;;  %s429_s29 = sshll.u32 %s683_s16, 7 }
  0x52   : > { %s420_s26 = sld [smem:[#allocation7 + $0x1]]  ;;  %v288_v47 = vunpack.c.l.s4 %v640_v46  ;;  %v290_v48 = vlaneseq  ;;  %s211_s30 = scalar_lea.vmem [#allocation9], %s417_s20 }
  0x53   : > { %v218_v4 = vsel %vm216_vm0, %v214_v1, 0.0  ;;  %v225_v5 = vcombine.high %v223_v3, %v223_v3  ;;  %v227_v6 = vsel %vm216_vm0, %v223_v3, 0.0  ;;  %s421_s27 = sld [smem:[#allocation7 + $0x2]]  ;;  %s312_s4 = sshll.u32 %s211_s30, 4  ;;  %s313_s4 = int_to_ptr.vmem [resolvable:$true] %s312_s4 }
  0x54   : > { %v219_v7 = vadd.f32 %v218_v4, %v217_v2  ;;  %s260_s28 = sld [smem:[#allocation7]]  ;;  %v289_v49 = vunpack.c.0.s8 %v288_v47  ;;  %v291_v50 = vshrl.u32 %v290_v48, 7  ;;  %s310_s10 = scalar_lea.hbm %s846_s3, %s429_s29 }
  0x55   : > { %v228_v8 = vsel %vm216_vm0, %v225_v5, 0.0  ;;  %s298_s8 = scalar_lea.sflag [#allocation4], %s788_s21  ;;  %s562_s11 = scalar_lea.vmem %s313_s4, 128 }
  0x56   : > { %220 = vadd.xlane.f32.xlu0 %v219_v7  ;;  %v229_v9 = vadd.f32 %v228_v8, %v227_v6  ;;  %v247_v21 = vstv %s246_s18  ;;  %v292_v51 = vsub.s32 %v289_v49, %v291_v50  ;;  %p563_p8 = scmp.ne.s32.totalorder %s313_s4, %s562_s11  ;;  %p864_p3 = scmp.ne.s32.totalorder %s856_s9, 0 }
  0x57   : > { %v250_v22 = vstv %s419_s25  ;;  %s641_s17 = smov [#allocation9]  }
  0x58   : > { %v264_v30 = vstv %s420_s26  ;;  %p564_p11 = pnand %p563_p8, %p864_p3  ;;  %s566_s16 = sshll.u32 %s641_s17, 4  ;;  %s567_s16 = int_to_ptr.vmem [resolvable:$false] %s566_s16 }
  0x59   : > { %v271_v31 = vstv %s421_s27  ;;  %s568_s20 = scalar_lea.vmem %s567_s16, 256  ;;  %p569_p9 = scmp.lt.s32.totalorder %s313_s4, %s567_s16 }
  0x5a   : > { %230 = vadd.xlane.f32.xlu0 %v229_v9  ;;  %v261_v34 = vstv %s260_s28  ;;  %p565_p0 = pneg %p564_p11  ;;  %p570_p1 = scmp.lt.s32.totalorder %s568_s20, %s562_s11 }
  0x5c   : > { %p571_p2 = por %p570_p1, %p569_p9 }
  0x5e   : > { %p572_p5 = pnand %p571_p2, %p565_p0 }
  0xdf   : > { %v221_v11 = vpop.xlane.xlu0 %220 }
  0xe0   : > { %v233_v12 = vmul.f32 0.00390625, %v221_v11 }
  0xe2   : > { %v234_v13 = vmul.f32 256.0, %v233_v12  ;;  %v248_v26 = vmul.f32 %v247_v21, %v233_v12 }
  0xe3   : > { %v231_v14 = vpop.xlane.xlu0 %230 }
  0xe4   : > { %v235_v15 = vmul.f32 %v234_v13, %v233_v12 }
  0xe6   : > { %v236_v16 = vsub.f32 %v231_v14, %v235_v15 }
  0xe8   : > { %v237_v17 = vmul.f32 0.003921569, %v236_v16 }
  0xea   : > { %v238_v18 = vmax.f32 %v237_v17, 0.0 }
  0xec   : > { %502 = vrsqrt.f32 %v238_v18  ;;  %vm241_vm1 = vcmp.eq.f32.partialorder %v238_v18, inf  ;;  %v244_v23 = vand.u32 2147483648, %v238_v18  ;;  %vm243_vm2 = vcmp.eq.f32.partialorder %v238_v18, 0.0 }
  0xf9   : > { %v503_v19 = vpop.eup %502 }
  0xfa   : > { %v240_v20 = vmul.f32 %v503_v19, %v238_v18 }
  0xfc   : > { %v242_v24 = vsel %vm241_vm1, %v238_v18, %v240_v20 }
  0xfd   : > { %v245_v25 = vsel %vm243_vm2, %v244_v23, %v242_v24 }
  0xfe   : > { %v251_v27 = vmul.f32 %v250_v22, %v245_v25 }
 0x100   : > { %v252_v28 = vadd.f32 %v251_v27, %v248_v26 }
 0x102   : > { %v254_v29 = vrot.slane %v252_v28, 7 }
 0x104   : > { %v257_v32 = vsel %vm256_vm3, 0.0, %v254_v29 }
 0x105   : > { %v259_v33 = vsel %vm258_vm4, %v257_v32, 0.0 }
 0x106   : > { %v265_v35 = vmul.f32 %v264_v30, %v259_v33  ;;  %v272_v36 = vmul.f32 %v271_v31, %v259_v33  ;;  %v262_v37 = vmul.f32 %v261_v34, %v259_v33 }
 0x108   : > { %v267_v38 = vrot.slane %v265_v35, 1  ;;  %v274_v40 = vrot.slane %v272_v36, 2 }
 0x10a   : > { %v269_v39 = vadd.f32 %v267_v38, %v262_v37 }
 0x10c   : > { %v276_v41 = vadd.f32 %v274_v40, %v269_v39 }
 0x10e   : > { %v422_v42 = vmul.f32 -1.442695, %v276_v41 }
 0x110   : > { %504 = vpow2.f32 %v422_v42 }
 0x11d   : > { %v505_v43 = vpop.eup %504 }
 0x11e   : > { %v280_v44 = vadd.f32 1.0, %v505_v43 }
 0x120   : > { %506 = vrcp.f32 %v280_v44 }
 0x12d   : > { %v507_v45 = vpop.eup %506 }
 0x12e   : > { %285 = vperm.xlu1 %499, %v507_v45  }
 0x1a9   : > { %v286_v52 = vpop.permute.xlu1 %285 }
 0x1aa   : > { %v293_v53 = vrot.slane %v286_v52, %v292_v51 }
 0x1ac   : > { %v295_v54 = vmul.f32 %v293_v53, %v798_v0 }
 0x1ae   : > { %296 = vst [vmem:[%s211_s30] sm:$0xff] %v295_v54 }
 0x1af   : > { %575 = shalt.err (!%p572_p5)
}
 0x1b0   : > { %s576_s22 = scalar_lea.hbm %s310_s10, 128  ;;  %s580_s18 = scalar_lea.hbm %s846_s3, 256 }
 0x1b1   : > { %p577_p7 = scmp.ne.s32.totalorder %s310_s10, %s576_s22  ;;  %p581_p12 = scmp.lt.s32.totalorder %s310_s10, %s846_s3 }
 0x1b2   : > { %p582_p13 = scmp.lt.s32.totalorder %s580_s18, %s576_s22 }
 0x1b3   : > { %p578_p10 = pnand %p577_p7, %p864_p3 }
 0x1b4   : > { %p583_p4 = por %p582_p13, %p581_p12 }
 0x1b5   : > { %p579_p6 = pneg %p578_p10 }
 0x1b7   : > { %p584_p8 = pnand %p583_p4, %p579_p6 }
 0x1b9   : > { %587 = shalt.err (!%p584_p8)
}
 0x1ba   : > { %440 = dma.vmem_to_hbm [thread:$0]  (%p864_p3), %s313_s4, 128, %s310_s10, %s298_s8  }
 0x1bb PF: > { %s324_s27 = sand.u32 1, %s622_s12   ;;  %p865_p11 = scmp.ne.s32.totalorder %s852_s19, 0 }
 0x1bc   : > { %p866_p0 = scmp.ge.s32.totalorder %s634_s15, 2  ;;  %s325_s28 = scalar_lea.sflag [#allocation4], %s324_s27 }
 0x1be   : > { %p454_p9 = pnand %p866_p0, %p865_p11 }
 0x1c0   : > { %p455_p1 = pneg %p454_p9 }
 0x1c2   : > { %617 = dma.done.wait (%p455_p1), %s325_s28, 128  }
 0x1c3   : > { %619 = vsyncadd (%p455_p1), %s325_s28, 4294967168  ;;  %p18_p2 = scmp.ge.s32.totalorder %s713_s24, 4   ;;  %s867_s12 = smov %s626_s13 }
 0x1c4   : > { %s868_s13 = smov %s630_s14  ;;  %s869_s14 = smov %s740_s7 }
 0x1c5   : > { %s870_s15 = smov %s713_s24  ;;  %20 = sbr.rel (!%p18_p2) target bundleno = 7 (0x7), region = 87 }
 0x1ca   :  { %330 = vsyncpa [#allocation3], 1 }
 0x1cb   :  { %332 = vsyncpa [#allocation3 + $0x1], 1 }
 0x1cc   :  { %333 = vsyncpa [#allocation4], 1 }
 0x1cd   :  { %335 = vsyncpa [#allocation4 + $0x1], 1 }
 0x1ce   :  { %336 = vsyncpa [#allocation5], 1 }
 0x1cf   :  { %338 = vsyncpa [#allocation5 + $0x1], 1 }
 0x1d0   :  { %339 = vsyncpa [#allocation6], 1 }
 0x1d1   :  { %341 = vsyncpa [#allocation6 + $0x1], 1 }

</bundles_post_ra>
